<compile_context>
chip_gen: v5e
topology: v5e:2x2
jax: 0.10.0
libtpu: 0.0.40
codegen_flags: <defaults>
</compile_context>

<pallas_src>
import functools

import jax
import jax.numpy as jnp
from jax.experimental import pallas as pl
from jax.experimental.pallas import tpu as pltpu


def _round_up(x: int, m: int) -> int:
    return ((x + m - 1) // m) * m


def _sublane_pad(rows: int, dtype) -> int:
    """Rows after padding to the native sublane tiling for this dtype."""
    packing = max(1, 4 // jnp.dtype(dtype).itemsize)
    return _round_up(rows, 8 * packing)


def _focal_loss_tile_kernel(*refs, alpha: float, gamma: float, num_classes: int,
                            num_valid, tile_n: int, has_weights: bool):
    """One tile of N voxels: (B, C, TN) logits, (B, TN) targets -> per-batch partial sums."""
    if has_weights:
        logits_ref, targets_ref, w_ref, fsum_ref, wsum_ref = refs
    else:
        logits_ref, targets_ref, fsum_ref = refs
        w_ref = wsum_ref = None

    x = logits_ref[...].astype(jnp.float32)              # (B, C, TN), N on lanes
    tgt = targets_ref[...].astype(jnp.int32)              # (B, TN)

    # Numerically-stable softmax over the (small) class axis == sublanes.
    m = jnp.max(x, axis=1, keepdims=True)                 # (B, 1, TN)
    e = jnp.exp(x - m)                                     # (B, C, TN)
    sumexp = jnp.sum(e, axis=1)                            # (B, TN)

    # One-hot mask over the sublane (class) axis; reused for pt and for weights.
    cls = jax.lax.broadcasted_iota(jnp.int32, e.shape, 1)
    onehot = cls == tgt[:, None, :]                        # (B, C, TN) bool
    exp_t = jnp.sum(jnp.where(onehot, e, 0.0), axis=1)     # (B, TN)

    # Matches: pt = sum(one_hot * (softmax + 1e-10)); log(pt + 1e-10).
    pt = exp_t / sumexp + 1e-10

    g = float(gamma)
    if g.is_integer() and 0 <= int(g) <= 8:
        base = 1.0 - pt                                    # exact match for integer gamma
        focal_term = jnp.ones_like(pt)
        for _ in range(int(g)):
            focal_term = focal_term * base                 # VALU multiply chain, no EUP
    else:
        # TODO(synk): fractional gamma clamps the base at 0 so a ~1e-10 overshoot of
        # pt past 1.0 cannot produce NaN (tiny deviation from the reference there).
        focal_term = jnp.power(jnp.maximum(1.0 - pt, 0.0), g)

    focal = (-alpha) * focal_term * jnp.log(pt + 1e-10)    # (B, TN)

    if has_weights:
        # Per-voxel class weight: select the broadcast weight column with the
        # one-hot mask already computed above and sublane-reduce (XLU).
        w_col = w_ref[...].astype(jnp.float32)             # (1, C, 1)
        w_b = jnp.broadcast_to(w_col, e.shape)              # (B, C, TN)
        w_elem = jnp.sum(jnp.where(onehot, w_b, 0.0), axis=1)   # (B, TN)

    # Mask the padded tail of the (partial) edge block.  Select, not multiply,
    # so garbage (possibly NaN) lanes cannot propagate.
    if num_valid is not None:
        pos = (pl.program_id(0) * tile_n
               + jax.lax.broadcasted_iota(jnp.int32, tgt.shape, 1))
        keep = pos < num_valid
        focal = jnp.where(keep, focal, 0.0)
        if has_weights:
            w_elem = jnp.where(keep, w_elem, 0.0)

    # Per-batch partial sums for this tile, broadcast across 128 lanes so the
    # output block is a clean (1, B, 128) tile (lane 0 is read back in JAX).
    out2d = fsum_ref.shape[1:]
    fsum_ref[0] = jnp.broadcast_to(jnp.sum(focal, axis=-1, keepdims=True), out2d)
    if has_weights:
        wsum_ref[0] = jnp.broadcast_to(jnp.sum(w_elem, axis=-1, keepdims=True), out2d)


def focal_loss_pallas(logits_ncdhw, targets_bdhw, weights=None,
                      alpha: float = 0.25, gamma: float = 2.0,
                      tile_n: int = 65536,
                      vmem_budget_bytes: int = 16 * 1024 * 1024):
    """logits: (B, C, D, H, W); targets: (B, D, H, W) int; weights: (C,) or None."""
    B, C, D, H, W = logits_ncdhw.shape
    N = D * H * W
    has_weights = weights is not None

    # Free, contiguous reshapes (channels already in front -> no transpose pass).
    logits_bcn = logits_ncdhw.reshape(B, C, N)
    targets_bn = targets_bdhw.reshape(B, N)
    # Keep targets in their narrowest integer dtype (uint8/int16/...) and upcast
    # in-kernel; only force int32 if they are not a (<=32-bit) integer type.
    if (not jnp.issubdtype(targets_bn.dtype, jnp.integer)
            or jnp.dtype(targets_bn.dtype).itemsize > 4):
        targets_bn = targets_bn.astype(jnp.int32)

    if has_weights:
        w_col = jnp.asarray(weights, dtype=jnp.float32).reshape(1, C, 1)

    # ---- Tile size from an explicit VMEM formula (double-buffered inputs) ----
    l_item = jnp.dtype(logits_bcn.dtype).itemsize
    t_item = jnp.dtype(targets_bn.dtype).itemsize
    bytes_per_col = (B * _sublane_pad(C, logits_bcn.dtype) * l_item
                     + _sublane_pad(B, targets_bn.dtype) * t_item)
    tn_vmem = max(128, (int(vmem_budget_bytes) // (2 * bytes_per_col)) // 128 * 128)
    tn = max(128, min((int(tile_n) // 128) * 128, tn_vmem))
    # Keep >= min(4, ceil(N/128)) tiles so the "parallel" grid axis can feed
    # both TensorCores on v7x (and stays pipelined everywhere).
    min_tiles = min(4, pl.cdiv(N, 128))
    tn = max(128, min(tn, _round_up(pl.cdiv(N, min_tiles), 128)))

    num_tiles = pl.cdiv(N, tn)          # no jnp.pad: partial edge block + in-kernel mask
    ragged = (N % tn) != 0

    # Scoped-VMEM limit: double-buffered inputs + tiny outputs + headroom,
    # capped so it is valid on v7x (64 MiB physical) and above v5e's 16 MiB default.
    in_vmem = 2 * bytes_per_col * tn
    out_vmem = 2 * (2 if has_weights else 1) * _sublane_pad(B, jnp.float32) * 128 * 4
    vmem_limit = int(min(48 * 1024 * 1024,
                         max(32 * 1024 * 1024, in_vmem + out_vmem + 8 * 1024 * 1024)))

    kernel = functools.partial(
        _focal_loss_tile_kernel,
        alpha=float(alpha), gamma=float(gamma), num_classes=C,
        num_valid=(N if ragged else None), tile_n=tn, has_weights=has_weights)

    in_specs = [
        pl.BlockSpec((B, C, tn), lambda i: (0, 0, i)),      # logits tile
        pl.BlockSpec((B, tn), lambda i: (0, i)),            # targets tile (narrow dtype)
    ]
    inputs = [logits_bcn, targets_bn]
    if has_weights:
        in_specs.append(pl.BlockSpec((1, C, 1), lambda i: (0, 0, 0)))   # weight column
        inputs.append(w_col)

    out_block = pl.BlockSpec((1, B, 128), lambda i: (i, 0, 0))
    out_sds = jax.ShapeDtypeStruct((num_tiles, B, 128), jnp.float32)
    if has_weights:
        out_specs = [out_block, out_block]
        out_shape = [out_sds, out_sds]
    else:
        out_specs = out_block
        out_shape = out_sds

    g = float(gamma)
    transcendentals = (C + 1) * B * N + (0 if g.is_integer() else 2 * B * N)
    bytes_accessed = (logits_bcn.size * l_item + targets_bn.size * t_item
                      + num_tiles * B * 128 * 4 * (2 if has_weights else 1))
    cost = pl.CostEstimate(flops=int((3 * C + 12) * B * N),
                           transcendentals=int(transcendentals),
                           bytes_accessed=int(bytes_accessed))

    result = pl.pallas_call(
        kernel,
        grid=(num_tiles,),
        in_specs=in_specs,
        out_specs=out_specs,
        out_shape=out_shape,
        compiler_params=pltpu.CompilerParams(
            dimension_semantics=("parallel",),      # independent tiles -> 2-TC sharding
            vmem_limit_bytes=vmem_limit,
        ),
        cost_estimate=cost,
    )(*inputs)

    # Tiny epilogue in plain JAX: tile-wise sums -> per-batch means -> loss.
    if has_weights:
        fsum, wsum = result
        focal_b = jnp.sum(fsum[:, :, 0], axis=0) / N        # (B,)
        w_b = jnp.sum(wsum[:, :, 0], axis=0) / N             # (B,)
        loss = jnp.mean(focal_b * w_b)
    else:
        fsum = result
        loss = jnp.mean(jnp.sum(fsum[:, :, 0], axis=0) / N)
    return jnp.maximum(loss, 0.0)


def focal_loss_ref(logits_ncdhw, targets_bdhw, weights=None,
                   alpha: float = 0.25, gamma: float = 2.0):
    """Pure-JAX reference mirroring the PyTorch module, for verification."""
    B, C = logits_ncdhw.shape[0], logits_ncdhw.shape[1]
    probs = jax.nn.softmax(logits_ncdhw.astype(jnp.float32), axis=1) + 1e-10
    one_hot = jax.nn.one_hot(targets_bdhw, C, axis=1, dtype=jnp.float32)
    pt = jnp.sum(one_hot * probs, axis=1)
    focal = -alpha * (1.0 - pt) ** gamma * jnp.log(pt + 1e-10)
    focal_b = jnp.mean(focal, axis=(1, 2, 3))
    if weights is not None:
        w = jnp.asarray(weights, jnp.float32)
        idx = targets_bdhw.reshape(B, -1)
        focal_b = focal_b * jnp.mean(w[idx], axis=-1)
    return jnp.maximum(jnp.mean(focal_b), 0.0)


if __name__ == "__main__":
    key = jax.random.PRNGKey(0)
    k1, k2, k3 = jax.random.split(key, 3)

    B, C, D, H, W = 2, 4, 4, 8, 8
    logits = jax.random.normal(k1, (B, C, D, H, W), dtype=jnp.float32)
    targets = jax.random.randint(k2, (B, D, H, W), 0, C, dtype=jnp.int32)
    class_weights = jnp.linspace(0.5, 1.5, C, dtype=jnp.float32)

    # 1) weighted, multi-tile parallel grid (tile auto-sized), f32 logits, int32 targets
    loss = jax.block_until_ready(focal_loss_pallas(logits, targets, class_weights))
    ref = focal_loss_ref(logits, targets, class_weights)
    assert jnp.allclose(loss, ref, rtol=1e-5, atol=1e-6), (loss, ref)

    # 2) unweighted specialization (single output), bf16 logits DMA'd as bf16
    logits_bf16 = logits.astype(jnp.bfloat16)
    loss2 = jax.block_until_ready(focal_loss_pallas(logits_bf16, targets, None))
    ref2 = focal_loss_ref(logits_bf16, targets, None)
    assert jnp.allclose(loss2, ref2, rtol=1e-5, atol=1e-6), (loss2, ref2)

    # 3) ragged N (not a multiple of 128): partial edge block with in-kernel mask,
    #    no pad copy; uint8 targets; integer gamma=3 multiply-chain path.
    D2 = 3
    logits3 = jax.random.normal(k3, (B, C, D2, H, W), dtype=jnp.float32)
    targets3 = targets[:, :D2].astype(jnp.uint8)
    loss3 = jax.block_until_ready(
        focal_loss_pallas(logits3, targets3, class_weights, gamma=3.0))
    ref3 = focal_loss_ref(logits3, targets3, class_weights, gamma=3.0)
    assert jnp.allclose(loss3, ref3, rtol=1e-5, atol=1e-6), (loss3, ref3)

    print("KERNEL_OK")
</pallas_src>

<mosaic_0001>
module attributes {stable_mosaic.version = 11 : i64} {
  func.func @_focal_loss_tile_kernel(%arg0: i32, %arg1: memref<2x4x128xf32, #tpu.memory_space<vmem>>, %arg2: memref<2x128xi32, #tpu.memory_space<vmem>>, %arg3: memref<1x4x1xf32, #tpu.memory_space<vmem>>, %arg4: memref<1x2x128xf32, #tpu.memory_space<vmem>>, %arg5: memref<1x2x128xf32, #tpu.memory_space<vmem>>) attributes {dimension_semantics = [#tpu.dimension_semantics<parallel>], iteration_bounds = array<i64: 2>, scalar_prefetch = 0 : i64, scratch_operands = 0 : i64, tpu.core_type = #tpu.core_type<tc>, window_params = [{transform_indices = @transform_0, window_bounds = array<i64: 2, 4, 128>}, {transform_indices = @transform_1, window_bounds = array<i64: 2, 128>}, {pipeline_mode = #tpu.pipeline_mode<synchronous>, transform_indices = @transform_2, window_bounds = array<i64: 1, 4, 1>}, {transform_indices = @transform_3, window_bounds = array<i64: 1, 2, 128>}, {transform_indices = @transform_4, window_bounds = array<i64: 1, 2, 128>}]} {
    %c0 = arith.constant 0 : index
    %c0_0 = arith.constant 0 : index
    %c0_1 = arith.constant 0 : index
    %0 = vector.load %arg1[%c0, %c0_0, %c0_1] : memref<2x4x128xf32, #tpu.memory_space<vmem>>, vector<2x4x128xf32>
    %c0_2 = arith.constant 0 : index
    %c0_3 = arith.constant 0 : index
    %1 = vector.load %arg2[%c0_2, %c0_3] : memref<2x128xi32, #tpu.memory_space<vmem>>, vector<2x128xi32>
    %cst = arith.constant dense<0xFF800000> : vector<2x128xf32>
    %2 = vector.multi_reduction <maximumf>, %0, %cst [1] : vector<2x4x128xf32> to vector<2x128xf32>
    %3 = vector.shape_cast %2 : vector<2x128xf32> to vector<2x1x128xf32>
    %4 = vector.broadcast %3 : vector<2x1x128xf32> to vector<2x4x128xf32>
    %5 = arith.subf %0, %4 : vector<2x4x128xf32>
    %6 = math.exp %5 : vector<2x4x128xf32>
    %cst_4 = arith.constant dense<0.000000e+00> : vector<2x128xf32>
    %7 = vector.multi_reduction <add>, %6, %cst_4 [1] : vector<2x4x128xf32> to vector<2x128xf32>
    %8 = tpu.iota {dimensions = array<i32: 1>} : vector<2x4x128xi32>
    %9 = vector.shape_cast %1 : vector<2x128xi32> to vector<2x1x128xi32>
    %10 = vector.broadcast %9 : vector<2x1x128xi32> to vector<2x4x128xi32>
    %11 = arith.cmpi eq, %8, %10 : vector<2x4x128xi32>
    %cst_5 = arith.constant 0.000000e+00 : f32
    %12 = vector.broadcast %cst_5 : f32 to vector<2x4x128xf32>
    %13 = arith.select %11, %6, %12 : vector<2x4x128xi1>, vector<2x4x128xf32>
    %cst_6 = arith.constant dense<0.000000e+00> : vector<2x128xf32>
    %14 = vector.multi_reduction <add>, %13, %cst_6 [1] : vector<2x4x128xf32> to vector<2x128xf32>
    %15 = arith.divf %14, %7 : vector<2x128xf32>
    %cst_7 = arith.constant 1.000000e-10 : f32
    %16 = vector.broadcast %cst_7 : f32 to vector<2x128xf32>
    %17 = arith.addf %15, %16 : vector<2x128xf32>
    %cst_8 = arith.constant 1.000000e+00 : f32
    %18 = vector.broadcast %cst_8 : f32 to vector<2x128xf32>
    %19 = arith.subf %18, %17 : vector<2x128xf32>
    %cst_9 = arith.constant 1.000000e+00 : f32
    %20 = vector.broadcast %cst_9 : f32 to vector<2x128xf32>
    %21 = arith.mulf %20, %19 : vector<2x128xf32>
    %22 = arith.mulf %21, %19 : vector<2x128xf32>
    %cst_10 = arith.constant -2.500000e-01 : f32
    %23 = vector.broadcast %cst_10 : f32 to vector<2x128xf32>
    %24 = arith.mulf %23, %22 : vector<2x128xf32>
    %cst_11 = arith.constant 1.000000e-10 : f32
    %25 = vector.broadcast %cst_11 : f32 to vector<2x128xf32>
    %26 = arith.addf %17, %25 : vector<2x128xf32>
    %27 = math.log %26 : vector<2x128xf32>
    %28 = arith.mulf %24, %27 : vector<2x128xf32>
    %c0_12 = arith.constant 0 : index
    %c0_13 = arith.constant 0 : index
    %c0_14 = arith.constant 0 : index
    %29 = vector.load %arg3[%c0_12, %c0_13, %c0_14] : memref<1x4x1xf32, #tpu.memory_space<vmem>>, vector<1x4x1xf32>
    %30 = vector.shape_cast %29 : vector<1x4x1xf32> to vector<1x4x1xf32>
    %31 = vector.broadcast %30 : vector<1x4x1xf32> to vector<2x4x128xf32>
    %cst_15 = arith.constant 0.000000e+00 : f32
    %32 = vector.broadcast %cst_15 : f32 to vector<2x4x128xf32>
    %33 = arith.select %11, %31, %32 : vector<2x4x128xi1>, vector<2x4x128xf32>
    %cst_16 = arith.constant dense<0.000000e+00> : vector<2x128xf32>
    %34 = vector.multi_reduction <add>, %33, %cst_16 [1] : vector<2x4x128xf32> to vector<2x128xf32>
    %cst_17 = arith.constant dense<0.000000e+00> : vector<2xf32>
    %35 = vector.multi_reduction <add>, %28, %cst_17 [1] : vector<2x128xf32> to vector<2xf32>
    %36 = vector.shape_cast %35 : vector<2xf32> to vector<2x1xf32>
    %37 = vector.shape_cast %36 : vector<2x1xf32> to vector<2x1xf32>
    %38 = vector.broadcast %37 : vector<2x1xf32> to vector<2x128xf32>
    %c0_18 = arith.constant 0 : index
    %c0_19 = arith.constant 0 : index
    %c0_20 = arith.constant 0 : index
    %39 = vector.load %arg4[%c0_18, %c0_19, %c0_20] : memref<1x2x128xf32, #tpu.memory_space<vmem>>, vector<1x2x128xf32>
    %40 = vector.shape_cast %39 : vector<1x2x128xf32> to vector<2x128xf32>
    %41 = vector.shape_cast %38 : vector<2x128xf32> to vector<1x2x128xf32>
    tpu.vector_store %arg4[%c0_18, %c0_19, %c0_20], %41 {strides = array<i32>} : memref<1x2x128xf32, #tpu.memory_space<vmem>>, vector<1x2x128xf32>,
    %cst_21 = arith.constant dense<0.000000e+00> : vector<2xf32>
    %42 = vector.multi_reduction <add>, %34, %cst_21 [1] : vector<2x128xf32> to vector<2xf32>
    %43 = vector.shape_cast %42 : vector<2xf32> to vector<2x1xf32>
    %44 = vector.shape_cast %43 : vector<2x1xf32> to vector<2x1xf32>
    %45 = vector.broadcast %44 : vector<2x1xf32> to vector<2x128xf32>
    %c0_22 = arith.constant 0 : index
    %c0_23 = arith.constant 0 : index
    %c0_24 = arith.constant 0 : index
    %46 = vector.load %arg5[%c0_22, %c0_23, %c0_24] : memref<1x2x128xf32, #tpu.memory_space<vmem>>, vector<1x2x128xf32>
    %47 = vector.shape_cast %46 : vector<1x2x128xf32> to vector<2x128xf32>
    %48 = vector.shape_cast %45 : vector<2x128xf32> to vector<1x2x128xf32>
    tpu.vector_store %arg5[%c0_22, %c0_23, %c0_24], %48 {strides = array<i32>} : memref<1x2x128xf32, #tpu.memory_space<vmem>>, vector<1x2x128xf32>,
    return
  }
  func.func @transform_0(%arg0: i32) -> (i32, i32, i32) {
    %c0_i32 = arith.constant 0 : i32
    %c0_i32_0 = arith.constant 0 : i32
    %c0_i32_1 = arith.constant 0 : i32
    return %c0_i32, %c0_i32_0, %arg0 : i32, i32, i32
  }
  func.func @transform_1(%arg0: i32) -> (i32, i32) {
    %c0_i32 = arith.constant 0 : i32
    %c0_i32_0 = arith.constant 0 : i32
    return %c0_i32, %arg0 : i32, i32
  }
  func.func @transform_2(%arg0: i32) -> (i32, i32, i32) {
    %c0_i32 = arith.constant 0 : i32
    %c0_i32_0 = arith.constant 0 : i32
    %c0_i32_1 = arith.constant 0 : i32
    %c0_i32_2 = arith.constant 0 : i32
    return %c0_i32, %c0_i32_0, %c0_i32_1 : i32, i32, i32
  }
  func.func @transform_3(%arg0: i32) -> (i32, i32, i32) {
    %c0_i32 = arith.constant 0 : i32
    %c0_i32_0 = arith.constant 0 : i32
    %c0_i32_1 = arith.constant 0 : i32
    return %arg0, %c0_i32, %c0_i32_0 : i32, i32, i32
  }
  func.func @transform_4(%arg0: i32) -> (i32, i32, i32) {
    %c0_i32 = arith.constant 0 : i32
    %c0_i32_0 = arith.constant 0 : i32
    %c0_i32_1 = arith.constant 0 : i32
    return %arg0, %c0_i32, %c0_i32_0 : i32, i32, i32
  }
}

</mosaic_0001>

<bundles_post_ra>
// kernel: tpu_custom_call.1
= control target key start
LH: loop header
LB: loop body
LE: loop exit
PB: predicated region body
PF: predicated region fallthrough
CT: control target
= control target key end

     0   :  { %10 = vsyncpa [#allocation3], 0  ;;  %s966_s0 = inlined_call_operand.hbm [shape: f32[2,4,256], index: 0, kind: input, shape index: {}]   ;;  %s967_s1 = inlined_call_operand.vmem [shape: s32[2,256], index: 1, kind: input, shape index: {}]   ;;  %s968_s2 = inlined_call_operand.vmem [shape: f32[1,4,1], index: 2, kind: input, shape index: {}]   ;;  %s969_s3 = inlined_call_operand.hbm [shape: f32[2,2,128], index: 3, kind: output, shape index: {0}]   ;;  %s970_s4 = inlined_call_operand.hbm [shape: f32[2,2,128], index: 4, kind: output, shape index: {1}]  }
   0x1   :  { %12 = vsyncpa [#allocation3 + $0x1], 0 }
   0x2   :  { %13 = vsyncpa [#allocation4], 0 }
   0x3   :  { %15 = vsyncpa [#allocation4 + $0x1], 0 }
   0x4   :  { %16 = vsyncpa [#allocation7], 0 }
   0x5   :  { %18 = vsyncpa [#allocation7 + $0x1], 0  ;;  %s785_s15 = smov 0   ;;  %s787_s16 = smov 0  }
   0x6   :  { %s789_s17 = smov 0   ;;  %s791_s18 = smov 0  }
   0x7 LB: > { %s806_s19 = sadd.s32 4294967295, %s754_s18   ;;  %s542_s20 = sadd.s32 4294967294, %s754_s18   ;;  %s754_s18 = sphi %s791_s18, %s981_s18   ;;  %s750_s17 = sphi %s789_s17, %s980_s17   ;;  %s746_s16 = sphi %s787_s16, %s979_s16   ;;  %s742_s15 = sphi %s785_s15, %s978_s15  }
   0x8   : > { %s810_s21 = sadd.s32 1, %s754_s18   ;;  %s31_s22 = sadd.s32 1, %s750_s17 }
   0x9   : > { %s28_s23 = ssub.s32 %s754_s18, %s810_s21  ;;  %p38_p0 = scmp.ne.s32.totalorder %s750_s17, %s746_s16 }
   0xa   : > { %p29_p1 = scmp.eq.s32.totalorder %s28_s23, 0  ;;  %p39_p2 = scmp.eq.s32.totalorder %s754_s18, 0 }
   0xb   : > { %p44_p3 = scmp.ne.s32.totalorder %s746_s16, %s742_s15  ;;  %p45_p4 = scmp.eq.s32.totalorder %s806_s19, 0 }
   0xc   : > { %s822_s24 = scalar_select %p29_p1, %s750_s17, %s31_s22  }
   0xd   : > { %p824_p5 = por %p39_p2, %p38_p0  ;;  %p828_p6 = por %p45_p4, %p44_p3 }
   0xe   : > { %p115_p7 = scmp.eq.s32.totalorder %s806_s19, 1  ;;  %p121_p8 = scmp.eq.s32.totalorder %s542_s20, 1 }
   0xf   : > { %p544_p9 = scmp.ge.s32.totalorder %s754_s18, 2  ;;  %p575_p10 = scmp.lt.s32.totalorder %s754_s18, 2 }
  0x10   : > { %p835_p11 = por %p115_p7, %p38_p0  ;;  %p839_p12 = por %p121_p8, %p44_p3 }
  0x11   : > { %s170_s29 = sand.u32 1, %s750_s17   ;;  %s546_s30 = sshll.u32 %s754_s18, 2 }
  0x12   : > { %s545_s5 = sshll.u32 %s170_s29, 3  ;;  %s178_s8 = scalar_lea.hbm %s966_s0, %s546_s30 }
  0x13   : > { %s179_s9 = sshll.u32 %s178_s8, 4  ;;  %s174_s10 = scalar_lea.vmem [#allocation2], %s545_s5  ;;  %s180_s9 = int_to_ptr.hbm [resolvable:$true] %s179_s9 }
  0x14   : > { %s181_s11 = sshll.u32 %s174_s10, 4  ;;  %p850_p13 = pnand %p575_p10, %p824_p5  ;;  %s182_s11 = int_to_ptr.vmem [resolvable:$true] %s181_s11 }
  0x15   : > { %p547_p0 = scmp.ge.s32.totalorder %s754_s18, 1  ;;  %s171_s13 = scalar_lea.sflag [#allocation3], %s170_s29 }
  0x16   : > { %s626_s14 = sshra.s32 %s180_s9, 4  ;;  %p630_p2 = pneg %p850_p13  ;;  %s627_s14 = int_to_ptr.hbm [resolvable:$true] %s626_s14 }
  0x17   : > { %s628_s20 = scalar_lea.hbm %s627_s14, 8  ;;  %s633_s30 = scalar_lea.hbm %s966_s0, 16 }
  0x18   : > { %p629_p1 = scmp.ne.s32.totalorder %s627_s14, %s628_s20  ;;  %p634_p5 = scmp.lt.s32.totalorder %s627_s14, %s966_s0 }
  0x19   : > { %p635_p7 = scmp.lt.s32.totalorder %s633_s30, %s628_s20 }
  0x1a   : > { %p631_p3 = pnand %p630_p2, %p629_p1 }
  0x1b   : > { %p636_p8 = por %p635_p7, %p634_p5 }
  0x1c   : > { %p632_p4 = pneg %p631_p3 }
  0x1e   : > { %p637_p10 = pnand %p636_p8, %p632_p4 }
  0x20   : > { %640 = shalt.err (!%p637_p10)
}
  0x21   : > { %s756_s29 = smov 128   ;;  %s757_s6 = smov 64  }
  0x22   : > { %s758_s7 = smov 4   ;;  %p196_p1 = scmp.lt.s32.totalorder %s754_s18, 3 }
  0x23   : > { %567 = dma.hbm_to_vmem [thread:$0]  (!%p850_p13), %s180_s9, 128, %s182_s11, %s171_s13, %s756_s29, %s757_s6, %s758_s7  }
  0x24   : > { %p197_p2 = pnand %p547_p0, %p196_p1 }
  0x25   : > { %s869_s8 = sand.u32 (!%p197_p2), 1, %s746_s16  }
  0x26   : > { %200 = sbr.rel (%p197_p2) target bundleno = 296 (0x128), region = 32  ;;  %s548_s10 = sshll.u32 (!%p197_p2), %s869_s8, 3 }
  0x27   : > { %s203_s14 = scalar_lea.sflag (!%p197_p2), [#allocation3], %s869_s8  ;;  %s206_s20 = scalar_lea.vmem (!%p197_p2), [#allocation2], %s548_s10 }
  0x2b   : > { %729 = dma.done.wait (%p828_p6), %s203_s14, 128  }
  0x2c   : > { %731 = vsyncadd (%p828_p6), %s203_s14, 4294967168  ;;  %v759_v0 = vmov 0   ;;  %v352_v1 = vld [vmem:[%s968_s2] sm:$0xf]  ;;  %vm248_vm0 = vcmask 1043456   ;;  %p241_p6 = scmp.lt.s32.totalorder %s806_s19, 1  ;;  %v283_v32 = vlaneseq }
  0x2d   : > { %613 = vset.pattern.permute.xlu0 %v759_v0  ;;  %v245_v2 = vld [vmem:[%s206_s20] sm:$0xf]  ;;  %v246_v3 = vld [vmem:[%s206_s20 + $0x4] sm:$0xf]  ;;  %vm376_vm11 = vcmask 1041409   ;;  %vm379_vm12 = vcmask 1041408  }
  0x2e   : > { %355 = vperm.xlu0 %613, %v352_v1   ;;  %v249_v4 = vsel %vm248_vm0, %v245_v2, -inf  ;;  %v256_v5 = vsel %vm248_vm0, %v246_v3, -inf  ;;  %s242_s26 = scalar_select %p241_p6, %s806_s19, 1  ;;  %v889_v38 = vshrl.u32 %v283_v32, 7 }
  0x2f   : > { %v250_v6 = vrot.slane %v249_v4, 4  ;;  %v257_v7 = vrot.slane %v256_v5, 4  ;;  %s549_s30 = sshll.u32 %s869_s8, 1  ;;  %s554_s25 = sshll.u32 %s806_s19, 1 }
  0x30   : > { %s551_s12 = sshll.u32 %s242_s26, 1  ;;  %s408_s6 = scalar_lea.hbm %s969_s3, %s554_s25 }
  0x31   : > { %v251_v8 = vmax.f32 %v249_v4, %v250_v6  ;;  %v258_v9 = vmax.f32 %v256_v5, %v257_v7  ;;  %s244_s23 = scalar_lea.vmem %s967_s1, %s551_s12  ;;  %s233_s7 = scalar_lea.vmem [#allocation5], %s549_s30 }
  0x32   : > { %v247_v36 = vld [vmem:[%s244_s23] sm:$0x3]  ;;  %s410_s10 = sshll.u32 %s233_s7, 4  ;;  %s412_s14 = sshll.u32 %s408_s6, 4  ;;  %s411_s10 = int_to_ptr.vmem [resolvable:$true] %s410_s10  ;;  %s413_s14 = int_to_ptr.hbm [resolvable:$true] %s412_s14 }
  0x33   : > { %v252_v10 = vrot.slane %v251_v8, 2  ;;  %v259_v11 = vrot.slane %v258_v9, 2  ;;  %v285_v40 = vrot.slane %v247_v36, 1  ;;  %v286_v42 = vperm.slane %v247_v36, 0  ;;  %s393_s20 = scalar_lea.sflag [#allocation4], %s869_s8  ;;  %s670_s9 = sshra.s32 %s413_s14, 4  ;;  %s671_s9 = int_to_ptr.hbm [resolvable:$true] %s670_s9 }
  0x34   : > { %s672_s11 = scalar_lea.hbm %s671_s9, 2  ;;  %s676_s12 = scalar_lea.hbm %s969_s3, 4 }
  0x35   : > { %v253_v12 = vmax.f32 %v251_v8, %v252_v10  ;;  %v260_v13 = vmax.f32 %v258_v9, %v259_v11  ;;  %v891_v43 = vperm.slane %v285_v40, 0  ;;  %vm894_vm1 = vcmp.eq.s32.totalorder %v889_v38, %v286_v42  ;;  %p673_p13 = scmp.ne.s32.totalorder %s671_s9, %s672_s11  ;;  %p677_p4 = scmp.lt.s32.totalorder %s671_s9, %s969_s3 }
  0x36   : > { %p678_p5 = scmp.lt.s32.totalorder %s676_s12, %s672_s11 }
  0x37   : > { %v254_v14 = vrot.slane %v253_v12, 1  ;;  %v261_v15 = vrot.slane %v260_v13, 1  ;;  %vm289_vm2 = vcmp.eq.s32.totalorder %v889_v38, %v891_v43  ;;  %p674_p0 = pnand %p673_p13, %p835_p11 }
  0x38   : > { %p679_p7 = por %p678_p5, %p677_p4 }
  0x39   : > { %v255_v16 = vmax.f32 %v253_v12, %v254_v14  ;;  %v262_v17 = vmax.f32 %v260_v13, %v261_v15  ;;  %p675_p3 = pneg %p674_p0 }
  0x3b   : > { %v263_v18 = vsub.f32 %v245_v2, %v255_v16  ;;  %v264_v19 = vsub.f32 %v246_v3, %v262_v17  ;;  %p680_p8 = pnand %p679_p7, %p675_p3 }
  0x3d   : > { %v265_v20 = vmul.f32 1.442695, %v263_v18  ;;  %v267_v21 = vmul.f32 1.442695, %v264_v19 }
  0x3f   : > { %614 = vpow2.f32 %v265_v20 }
  0x40   : > { %616 = vpow2.f32 %v267_v21 }
  0x45   : > { %v615_v22 = vpop.eup %614 }
  0x46   : > { %v617_v23 = vpop.eup %616  ;;  %v269_v24 = vsel %vm248_vm0, %v615_v22, 0.0  ;;  %v290_v45 = vsel %vm894_vm1, %v615_v22, 0.0 }
  0x47   : > { %v270_v25 = vrot.slane %v269_v24, 4  ;;  %v276_v26 = vsel %vm248_vm0, %v617_v23, 0.0  ;;  %v291_v46 = vsel %vm289_vm2, %v617_v23, 0.0  ;;  %v292_v47 = vsel %vm248_vm0, %v290_v45, 0.0 }
  0x48   : > { %v277_v27 = vrot.slane %v276_v26, 4  ;;  %v299_v48 = vsel %vm248_vm0, %v291_v46, 0.0  ;;  %v293_v49 = vrot.slane %v292_v47, 4 }
  0x49   : > { %v271_v28 = vadd.f32 %v270_v25, %v269_v24  ;;  %v300_v50 = vrot.slane %v299_v48, 4 }
  0x4a   : > { %v278_v29 = vadd.f32 %v277_v27, %v276_v26  ;;  %v294_v53 = vadd.f32 %v293_v49, %v292_v47 }
  0x4b   : > { %v272_v30 = vrot.slane %v271_v28, 2  ;;  %v301_v54 = vadd.f32 %v300_v50, %v299_v48 }
  0x4c   : > { %v279_v31 = vrot.slane %v278_v29, 2  ;;  %v295_v57 = vrot.slane %v294_v53, 2 }
  0x4d   : > { %v273_v33 = vadd.f32 %v272_v30, %v271_v28  ;;  %v302_v58 = vrot.slane %v301_v54, 2 }
  0x4e   : > { %v280_v34 = vadd.f32 %v279_v31, %v278_v29  ;;  %v296_v61 = vadd.f32 %v295_v57, %v294_v53 }
  0x4f   : > { %v274_v35 = vrot.slane %v273_v33, 1  ;;  %v303_v62 = vadd.f32 %v302_v58, %v301_v54 }
  0x50   : > { %v281_v37 = vrot.slane %v280_v34, 1  ;;  %v297_v3 = vrot.slane %v296_v61, 1 }
  0x51   : > { %v275_v39 = vadd.f32 %v274_v35, %v273_v33  ;;  %v304_v4 = vrot.slane %v303_v62, 1 }
  0x52   : > { %v282_v41 = vadd.f32 %v281_v37, %v280_v34  ;;  %v298_v9 = vadd.f32 %v297_v3, %v296_v61 }
  0x53   : > { %618 = vrcp.f32 %v275_v39  ;;  %v317_v0 = vand.u32 2147483648, %v275_v39  ;;  %vm311_vm3 = vweird.f32 %v275_v39  ;;  %v315_v6 = vand.u32 2147483647, %v275_v39 }
  0x54   : > { %620 = vrcp.f32 %v282_v41  ;;  %v332_v2 = vand.u32 2147483648, %v282_v41  ;;  %v305_v10 = vadd.f32 %v304_v4, %v303_v62  ;;  %vm326_vm6 = vweird.f32 %v282_v41 }
  0x55   : > { %v318_v7 = vor.u32 1.1754944e-38, %v317_v0  ;;  %vm316_vm8 = vcmp.eq.f32.partialorder %v315_v6, 8.507059e+37  ;;  %v330_v12 = vand.u32 2147483647, %v282_v41 }
  0x56   : > { %v333_v13 = vor.u32 1.1754944e-38, %v332_v2 }
  0x57   : > { %vm331_vm10 = vcmp.eq.f32.partialorder %v330_v12, 8.507059e+37 }
  0x59   : > { %v619_v51 = vpop.eup %618 }
  0x5a   : > { %v621_v52 = vpop.eup %620  ;;  %v307_v55 = vmul.f32 %v619_v51, %v275_v39  ;;  %vm312_vm4 = vweird.f32 %v619_v51 }
  0x5b   : > { %v322_v56 = vmul.f32 %v621_v52, %v282_v41  ;;  %vm313_vm5 = vmor %vm311_vm3, %vm312_vm4  ;;  %vm327_vm7 = vweird.f32 %v621_v52 }
  0x5c   : > { %v308_v59 = vsub.f32 1.0, %v307_v55  ;;  %vm328_vm9 = vmor %vm326_vm6, %vm327_vm7 }
  0x5d   : > { %v323_v60 = vsub.f32 1.0, %v322_v56 }
  0x5e   : > { %v309_v63 = vmul.f32 %v619_v51, %v308_v59 }
  0x5f   : > { %v324_v1 = vmul.f32 %v621_v52, %v323_v60 }
  0x60   : > { %v310_v5 = vadd.f32 %v619_v51, %v309_v63 }
  0x61   : > { %v325_v8 = vadd.f32 %v621_v52, %v324_v1 }
  0x62   : > { %v314_v11 = vsel %vm313_vm5, %v619_v51, %v310_v5 }
  0x63   : > { %v319_v14 = vsel %vm316_vm8, %v318_v7, %v314_v11  ;;  %v329_v15 = vsel %vm328_vm9, %v621_v52, %v325_v8 }
  0x64   : > { %v320_v16 = vmul.f32 %v319_v14, %v298_v9  ;;  %v334_v17 = vsel %vm331_vm10, %v333_v13, %v329_v15 }
  0x65   : > { %v335_v18 = vmul.f32 %v334_v17, %v305_v10 }
  0x66   : > { %v336_v19 = vadd.f32 1e-10, %v320_v16 }
  0x67   : > { %v337_v20 = vadd.f32 1e-10, %v335_v18 }
  0x68   : > { %v344_v21 = vadd.f32 1e-10, %v336_v19  ;;  %v338_v23 = vsub.f32 1.0, %v336_v19 }
  0x69   : > { %v345_v22 = vadd.f32 1e-10, %v337_v20  ;;  %v339_v24 = vsub.f32 1.0, %v337_v20 }
  0x6a   : > { %622 = vlog2.f32 %v344_v21  ;;  %v340_v25 = vmul.f32 %v338_v23, %v338_v23 }
  0x6b   : > { %624 = vlog2.f32 %v345_v22  ;;  %v341_v26 = vmul.f32 %v339_v24, %v339_v24 }
  0x6c   : > { %v342_v28 = vmul.f32 -0.25, %v340_v25 }
  0x6d   : > { %v343_v29 = vmul.f32 -0.25, %v341_v26 }
  0x70   : > { %v623_v27 = vpop.eup %622 }
  0x71   : > { %v347_v30 = vmul.f32 0.6931472, %v623_v27  ;;  %v625_v31 = vpop.eup %624 }
  0x72   : > { %v349_v32 = vmul.f32 0.6931472, %v625_v31 }
  0x73   : > { %v350_v33 = vmul.f32 %v347_v30, %v342_v28 }
  0x74   : > { %v351_v34 = vmul.f32 %v349_v32, %v343_v29 }
  0x76   : > { %v377_v35 = vsel %vm376_vm11, %v351_v34, %v350_v33 }
  0x77   : > { %v380_v36 = vsel %vm379_vm12, %v377_v35, 0.0 }
  0x78   : > { %381 = vadd.xlane.f32.xlu0 %v380_v36 }
  0xa0   : > { %v356_v37 = vpop.permute.xlu0 %355 }
  0xa1   : > { %v358_v39 = vsel %vm894_vm1, %v356_v37, 0.0  ;;  %v359_v40 = vsel %vm289_vm2, %v356_v37, 0.0 }
  0xa2   : > { %v360_v41 = vsel %vm248_vm0, %v358_v39, 0.0  ;;  %v367_v42 = vsel %vm248_vm0, %v359_v40, 0.0 }
  0xa3   : > { %v361_v45 = vrot.slane %v360_v41, 4  ;;  %v368_v46 = vrot.slane %v367_v42, 4 }
  0xa5   : > { %v362_v47 = vadd.f32 %v361_v45, %v360_v41  ;;  %v369_v48 = vadd.f32 %v368_v46, %v367_v42 }
  0xa7   : > { %v363_v49 = vrot.slane %v362_v47, 2  ;;  %v370_v50 = vrot.slane %v369_v48, 2 }
  0xa9   : > { %v364_v51 = vadd.f32 %v363_v49, %v362_v47  ;;  %v371_v52 = vadd.f32 %v370_v50, %v369_v48 }
  0xab   : > { %v365_v44 = vrot.slane %v364_v51, 1  ;;  %v372_v53 = vrot.slane %v371_v52, 1 }
  0xad   : > { %v366_v54 = vadd.f32 %v365_v44, %v364_v51  ;;  %v373_v38 = vadd.f32 %v372_v53, %v371_v52 }
  0xaf   : > { %v386_v43 = vsel %vm376_vm11, %v373_v38, %v366_v54 }
  0xb0   : > { %v388_v55 = vsel %vm379_vm12, %v386_v43, 0.0 }
  0xb1   : > { %389 = vadd.xlane.f32.xlu1 %v388_v55 }
  0xeb   : > { %v382_v56 = vpop.xlane.xlu0 %381 }
  0xec   : > { %383 = vst [vmem:[%s233_s7] sm:$0x3] %v382_v56 }
  0xed   : > { %683 = shalt.err (!%p680_p8)
}
  0xee   : > { %560 = dma.vmem_to_hbm [thread:$0]  (%p835_p11), %s411_s10, 32, %s413_s14, %s393_s20  }
  0xef   : > { %s422_s29 = scalar_lea.hbm %s970_s4, %s554_s25  ;;  %s240_s6 = scalar_lea.vmem [#allocation6], %s549_s30 }
  0xf0   : > { %s424_s7 = sshll.u32 %s240_s6, 4  ;;  %s426_s19 = sshll.u32 %s422_s29, 4  ;;  %s425_s7 = int_to_ptr.vmem [resolvable:$true] %s424_s7  ;;  %s427_s19 = int_to_ptr.hbm [resolvable:$true] %s426_s19 }
  0xf1   : > { %s398_s9 = scalar_lea.sflag [#allocation7], %s869_s8  ;;  %s698_s11 = sshra.s32 %s427_s19, 4  ;;  %s699_s11 = int_to_ptr.hbm [resolvable:$true] %s698_s11 }
  0xf2   : > { %s700_s26 = scalar_lea.hbm %s699_s11, 2  ;;  %s704_s20 = scalar_lea.hbm %s970_s4, 4 }
  0xf3   : > { %p701_p10 = scmp.ne.s32.totalorder %s699_s11, %s700_s26  ;;  %p705_p6 = scmp.lt.s32.totalorder %s699_s11, %s970_s4 }
  0xf4   : > { %p706_p13 = scmp.lt.s32.totalorder %s704_s20, %s700_s26 }
  0xf5   : > { %p702_p1 = pnand %p701_p10, %p835_p11 }
  0xf6   : > { %p707_p0 = por %p706_p13, %p705_p6 }
  0xf7   : > { %p703_p2 = pneg %p702_p1 }
  0xf9   : > { %p708_p3 = pnand %p707_p0, %p703_p2 }
 0x124   : > { %v390_v57 = vpop.xlane.xlu1 %389 }
 0x125   : > { %391 = vst [vmem:[%s240_s6] sm:$0x3] %v390_v57 }
 0x126   : > { %711 = shalt.err (!%p708_p3)
}
 0x127   : > { %561 = dma.vmem_to_hbm [thread:$0]  (%p835_p11), %s425_s7, 32, %s427_s19, %s398_s9  }
 0x128 PF: > { %s438_s8 = sand.u32 1, %s742_s15   ;;  %p569_p4 = pnand %p544_p9, %p839_p12 }
 0x129   : > { %s439_s12 = scalar_lea.sflag [#allocation4], %s438_s8 }
 0x12a   : > { %p570_p5 = pneg %p569_p4 }
 0x12c   : > { %733 = dma.done.wait (%p570_p5), %s439_s12, 32  }
 0x12d   : > { %735 = vsyncadd (%p570_p5), %s439_s12, 4294967264  ;;  %s449_s13 = scalar_lea.sflag [#allocation7], %s438_s8 }
 0x12e   : > { %737 = dma.done.wait (%p570_p5), %s449_s13, 32  }
 0x12f   : > { %739 = vsyncadd (%p570_p5), %s449_s13, 4294967264  ;;  %p21_p11 = scmp.ge.s32.totalorder %s810_s21, 4   ;;  %s978_s15 = smov %s746_s16 }
 0x130   : > { %s979_s16 = smov %s750_s17  ;;  %s980_s17 = smov %s822_s24 }
 0x131   : > { %s981_s18 = smov %s810_s21  ;;  %23 = sbr.rel (!%p21_p11) target bundleno = 7 (0x7), region = 97 }
 0x136   :  { %455 = vsyncpa [#allocation3], 1 }
 0x137   :  { %457 = vsyncpa [#allocation3 + $0x1], 1 }
 0x138   :  { %458 = vsyncpa [#allocation4], 1 }
 0x139   :  { %460 = vsyncpa [#allocation4 + $0x1], 1 }
 0x13a   :  { %461 = vsyncpa [#allocation7], 1 }
 0x13b   :  { %463 = vsyncpa [#allocation7 + $0x1], 1 }

</bundles_post_ra>
